<compile_context>
chip_gen: v6e
topology: v6e:2x2x1
jax: 0.10.0
libtpu: 0.0.40
codegen_flags: <defaults>
</compile_context>

<pallas_src>
import math

import jax
import jax.numpy as jnp
from jax.experimental import pallas as pl
from jax.experimental.pallas import tpu as pltpu

# ---- module hyper-parameters (ArgmaxFlow defaults) ----
CONTEXT_SIZE = 8
NUM_CLASSES = 5
EMB_DIM = 7
MAX_NODES = 9
BATCH = 2
SEQ = CONTEXT_SIZE * MAX_NODES                      # 72 tokens per example

HW = MAX_NODES * NUM_CLASSES                        # 45  = conv output plane, flattened (h*5 + w)
CTX_OUT = NUM_CLASSES * EMB_DIM                     # 35  = ContextNet output width
GROUP = 128                                         # lane group width (one vreg column block)
K_LANES = NUM_CLASSES * GROUP                       # 640 = class-major, lane-padded patch width
N_LANES = 3 * GROUP                                 # 384 = [mean|0][log_std|0][context|0] columns
OUT_LANES = 2 * GROUP                               # 256 = [z|ldj|0][context|0] output slab
_HALF_LOG_2PI = 0.5 * math.log(2.0 * math.pi)


# ---------------------------------------------------------------------------
# The single fused kernel:
#   x_ref   : (bt, 128) int32  -- class ids for the 72 tokens, -1 sentinel in lanes 72..127
#   eps_ref : (bt, 128) f32    -- reparameterization noise (h*5 + w) in lanes 0..44, zeros elsewhere
#   w_ref   : (640, 384) bf16  -- folded [Linear+ReLU+Conv | ContextNet] weights (128-aligned groups)
#   b_ref   : (1, 384)   f32   -- folded biases (zero in pad columns)
#   out_ref : (bt, 256)  f32   -- [ z(45) | ldj(1) | 0 ... | context(35) | 0 ... ]
# ---------------------------------------------------------------------------
def _argmax_flow_kernel(x_ref, eps_ref, w_ref, b_ref, out_ref):
    bt = x_ref.shape[0]

    xp = x_ref[...]                                      # (bt, 128) int32
    # class-major one-hot patches: five lane-dense compares, concatenated at 128-lane boundaries
    # (pure vreg placement, no cross-lane movement).  bf16 cast is exact on 0/1.
    patches = jnp.concatenate(
        [(xp == k).astype(jnp.bfloat16) for k in range(NUM_CLASSES)], axis=1)   # (bt, 640)

    # ONE single-pass bf16 MXU matmul covers encoder Linear+ReLU+Conv2d and the ContextNet Linear
    act = jnp.dot(patches, w_ref[...],
                  preferred_element_type=jnp.float32) + b_ref[...]              # (bt, 384) f32

    mean_g = act[:, 0 * GROUP:1 * GROUP]                 # [mean(45)    | exact zeros]
    ls_g = act[:, 1 * GROUP:2 * GROUP]                   # [log_std(45) | exact zeros]
    ctx_g = act[:, 2 * GROUP:3 * GROUP]                  # [context(35) | exact zeros]

    eps = eps_ref[...]                                   # zeros beyond lane 44
    z_g = mean_g + jnp.exp(ls_g) * eps                   # pad lanes stay exactly 0

    # Normal(mean, exp(log_std)).log_prob(z) = -0.5*eps^2 - log_std - 0.5*log(2*pi); ldj = -sum(.)
    # Pad lanes contribute exactly 0, so the 128-lane reduction equals the 45-lane one; the
    # 0.5*log(2*pi) constant is hoisted out of the reduction.
    log_q = jnp.sum(-0.5 * eps * eps - ls_g, axis=1, keepdims=True) - HW * _HALF_LOG_2PI
    ldj = -log_q                                         # (bt, 1)

    lane = jax.lax.broadcasted_iota(jnp.int32, (bt, GROUP), 1)
    zslab = jnp.where(lane == HW, ldj, z_g)              # ldj dropped into the (zero) lane 45
    out_ref[...] = jnp.concatenate([zslab, ctx_g], axis=1)   # two unmasked 128-lane groups


def _choose_tiles(B, cap=256):
    """8-aligned batch tile capped at `cap` rows.  >=2 grid steps whenever B > 8 so the 'parallel'
    grid axis can shard across v7x's two TensorCores; remainder handled by wrapper batch padding."""
    nb = max(pl.cdiv(B, cap), 2 if B > 8 else 1)
    bt = 8 * pl.cdiv(pl.cdiv(B, nb), 8)
    return bt, nb


def argmax_flow_fused(x_pad, eps_pad, w_all, bias_all, bt, nb):
    Bp = x_pad.shape[0]
    return pl.pallas_call(
        _argmax_flow_kernel,
        out_shape=jax.ShapeDtypeStruct((Bp, OUT_LANES), jnp.float32),
        grid=(nb,),
        in_specs=[
            pl.BlockSpec((bt, GROUP), lambda i: (i, 0)),
            pl.BlockSpec((bt, GROUP), lambda i: (i, 0)),
            pl.BlockSpec((K_LANES, N_LANES), lambda i: (0, 0)),   # folded weights, shared by all tiles
            pl.BlockSpec((1, N_LANES), lambda i: (0, 0)),
        ],
        out_specs=pl.BlockSpec((bt, OUT_LANES), lambda i: (i, 0)),
        compiler_params=pltpu.CompilerParams(dimension_semantics=("parallel",)),
    )(x_pad, eps_pad, w_all, bias_all)


# ---------------------------------------------------------------------------
# One-time static weight folding (wrapper side; free at trace time).  Rows are class-major,
# per-class 128 rows (72 tokens + 56 zero rows matching the sentinel lanes); columns are three
# 128-lane groups [mean | log_std | context], zero-padded.
# ---------------------------------------------------------------------------
def fold_params(p):
    hp = jax.lax.Precision.HIGHEST

    # encoder Linear + ReLU folded over the class id
    g = jnp.maximum(jnp.dot(p["emb_table"], p["enc_w"], precision=hp) + p["enc_b"][None, :], 0.0)
    gp = jnp.pad(g, ((0, 0), (1, 1)))                                                # (5, 7) conv w-pad
    gpw = jnp.stack([gp[:, kx:kx + NUM_CLASSES] for kx in range(3)], axis=-1)        # (5, 5, 3) [k,w,kx]
    core = jnp.einsum('ocyx,kwx->kcoyw', p["conv_w"], gpw, precision=hp)             # (5, 8, 2, 3, 5)

    # conv h-handling without explicit padded rows: input row h' feeds output h via tap ky iff
    # h' - h == ky - 1 (zero conv padding contributes nothing, so border rows simply get fewer taps)
    hh = jnp.arange(MAX_NODES)
    sel = ((hh[:, None, None] - hh[None, :, None])
           == (jnp.arange(3)[None, None, :] - 1)).astype(jnp.float32)                # (h', h, ky)
    mls = jnp.einsum('kcoyw,phy->kcpohw', core, sel, precision=hp)                   # (5, 8, 9, 2, 9, 5)
    mls = mls.reshape(NUM_CLASSES, SEQ, 2, HW)                                       # rows n = c*9 + h'

    # ContextNet Embedding + Linear folded over the class id, token order matches x's flat order
    cw = jnp.einsum('ke,nej->nkj', p["emb_table"],
                    p["ctx_w"].reshape(SEQ, EMB_DIM, CTX_OUT), precision=hp)         # (72, 5, 35)
    cw = cw.transpose(1, 0, 2)                                                       # (5, 72, 35)

    def lane_pad(a):  # pad last dim to one 128-lane group
        return jnp.pad(a, ((0, 0), (0, 0), (0, GROUP - a.shape[-1])))

    w_groups = jnp.concatenate([lane_pad(mls[:, :, 0, :]),        # mean group
                                lane_pad(mls[:, :, 1, :]),        # log_std group
                                lane_pad(cw)], axis=-1)           # context group -> (5, 72, 384)
    w_all = jnp.pad(w_groups, ((0, 0), (0, GROUP - SEQ), (0, 0)))                     # (5, 128, 384)
    w_all = w_all.reshape(K_LANES, N_LANES).astype(jnp.bfloat16)                      # (640, 384)

    def col_pad(v):
        return jnp.pad(v, (0, GROUP - v.shape[0]))

    bias_all = jnp.concatenate([col_pad(jnp.full((HW,), p["conv_b"][0], jnp.float32)),
                                col_pad(jnp.full((HW,), p["conv_b"][1], jnp.float32)),
                                col_pad(p["ctx_b"])])[None, :]                        # (1, 384) f32
    return {"w_all": w_all, "bias_all": bias_all}


# ---------------------------------------------------------------------------
# ArgmaxFlow forward (wrapper: 3 tiny padding ops; compute: the fused Pallas kernel)
# ---------------------------------------------------------------------------
def argmax_flow_forward(x, eps, folded):
    B = x.shape[0]
    bt, nb = _choose_tiles(B)
    B_pad = bt * nb
    # lane/batch padding: -1 sentinel never matches a class id -> padded lanes/rows read as "no token"
    x_pad = jnp.pad(x.astype(jnp.int32),
                    ((0, B_pad - B), (0, GROUP - SEQ)), constant_values=-1)           # (B_pad, 128)
    eps_pad = jnp.pad(eps.reshape(B, HW), ((0, B_pad - B), (0, GROUP - HW)))           # (B_pad, 128)

    slab = argmax_flow_fused(x_pad, eps_pad, folded["w_all"], folded["bias_all"], bt, nb)

    z = slab[:B, :HW].reshape(B, 1, MAX_NODES, NUM_CLASSES)       # split_dim=1 -> 1 channel
    log_prob = slab[:B, HW]                                       # ArgmaxSurjection ldj = -log q(z|x)
    context = slab[:B, GROUP:GROUP + CTX_OUT]
    # TODO(synk): `context` would condition the ConditionalAdjacencyBlockFlow transforms (source not
    # provided), so it is computed but not consumed downstream.
    # TODO(synk): the 12 AdjacencyBlockFlow transforms (and the 6 conditional ones inside the
    # surjection's encoder flow) are skipped: their definitions are not in the provided source.
    return z, log_prob, context


# ---------------------------------------------------------------------------
# Pure-JAX f32 reference of the same forward (unfused), used only for validation.
# ---------------------------------------------------------------------------
def argmax_flow_reference(x, eps, params):
    hp = jax.lax.Precision.HIGHEST
    B = x.shape[0]
    emb = params["emb_table"][x]                                                      # (B, 72, 7)
    context = jnp.dot(emb.reshape(B, SEQ * EMB_DIM), params["ctx_w"], precision=hp) + params["ctx_b"]
    a = jnp.maximum(jnp.einsum('bne,ec->bnc', emb, params["enc_w"], precision=hp)
                    + params["enc_b"], 0.0)                                           # (B, 72, 5)
    a = a.reshape(B, CONTEXT_SIZE, MAX_NODES, NUM_CLASSES)
    out = jax.lax.conv_general_dilated(a, params["conv_w"], window_strides=(1, 1),
                                       padding="SAME",
                                       dimension_numbers=("NCHW", "OIHW", "NCHW"),
                                       precision=hp)
    out = out + params["conv_b"][None, :, None, None]
    mean, log_std = out[:, 0], out[:, 1]
    z = mean + jnp.exp(log_std) * eps
    log_q = jnp.sum((-0.5 * eps * eps - log_std - _HALF_LOG_2PI).reshape(B, -1), axis=1)
    return z[:, None], -log_q, context


def init_params(key):
    ks = jax.random.split(key, 8)
    return {
        "emb_table": 0.1 * jax.random.normal(ks[0], (NUM_CLASSES, EMB_DIM), jnp.float32),
        # LazyLinear(num_classes * embedding_dim) on flattened (B, N*E)
        "ctx_w": 0.05 * jax.random.normal(ks[1], (SEQ * EMB_DIM, CTX_OUT), jnp.float32),
        "ctx_b": 0.01 * jax.random.normal(ks[2], (CTX_OUT,), jnp.float32),
        # nn.Linear(embedding_dim, num_classes)  (stored as (in, out))
        "enc_w": 0.2 * jax.random.normal(ks[3], (EMB_DIM, NUM_CLASSES), jnp.float32),
        "enc_b": 0.01 * jax.random.normal(ks[4], (NUM_CLASSES,), jnp.float32),
        # nn.Conv2d(context_size, 2, 3, 1, 1)  weight layout (out, in, kH, kW) like PyTorch
        "conv_w": 0.1 * jax.random.normal(ks[5], (2, CONTEXT_SIZE, 3, 3), jnp.float32),
        "conv_b": 0.01 * jax.random.normal(ks[6], (2,), jnp.float32),
    }


if __name__ == "__main__":
    key = jax.random.PRNGKey(0)
    k_param, k_x, k_eps = jax.random.split(key, 3)

    params = init_params(k_param)
    x = jax.random.randint(k_x, (BATCH, SEQ), 0, NUM_CLASSES, dtype=jnp.int32)
    eps = jax.random.normal(k_eps, (BATCH, MAX_NODES, NUM_CLASSES), jnp.float32)

    folded = fold_params(params)                       # one-time static weight folding (bf16 weights)
    fwd = jax.jit(argmax_flow_forward)
    z, log_prob, context = fwd(x, eps, folded)
    jax.block_until_ready((z, log_prob, context))

    assert z.shape == (BATCH, 1, MAX_NODES, NUM_CLASSES)
    assert log_prob.shape == (BATCH,)
    assert context.shape == (BATCH, CTX_OUT)

    # Validate against the f32 reference.  The kernel's single-pass bf16 matmul quantizes only the
    # folded weights (the 0/1 patches are exact in bf16), so tolerances cover bf16 weight rounding:
    # per-element outputs ~5e-3, the 45-term ldj reduction ~2e-2.
    z_r, lp_r, ctx_r = argmax_flow_reference(x, eps, params)
    for name, got, ref, tol in (("z", z, z_r, 5e-3),
                                ("log_prob", log_prob, lp_r, 2e-2),
                                ("context", context, ctx_r, 5e-3)):
        err = float(jnp.max(jnp.abs(got - ref)))
        assert err < tol, f"{name} mismatch vs reference: {err}"

    print("KERNEL_OK")
</pallas_src>

<mosaic_0001>
module attributes {stable_mosaic.version = 11 : i64} {
  func.func @_argmax_flow_kernel(%arg0: i32, %arg1: memref<8x128xi32, #tpu.memory_space<vmem>>, %arg2: memref<8x128xf32, #tpu.memory_space<vmem>>, %arg3: memref<640x384xbf16, #tpu.memory_space<vmem>>, %arg4: memref<1x384xf32, #tpu.memory_space<vmem>>, %arg5: memref<8x256xf32, #tpu.memory_space<vmem>>) attributes {dimension_semantics = [#tpu.dimension_semantics<parallel>], iteration_bounds = array<i64: 1>, scalar_prefetch = 0 : i64, scratch_operands = 0 : i64, tpu.core_type = #tpu.core_type<tc>, window_params = [{transform_indices = @transform_0, window_bounds = array<i64: 8, 128>}, {transform_indices = @transform_1, window_bounds = array<i64: 8, 128>}, {pipeline_mode = #tpu.pipeline_mode<synchronous>, transform_indices = @transform_2, window_bounds = array<i64: 640, 384>}, {pipeline_mode = #tpu.pipeline_mode<synchronous>, transform_indices = @transform_3, window_bounds = array<i64: 1, 384>}, {transform_indices = @transform_4, window_bounds = array<i64: 8, 256>}]} {
    %c0 = arith.constant 0 : index
    %c0_0 = arith.constant 0 : index
    %0 = vector.load %arg1[%c0, %c0_0] : memref<8x128xi32, #tpu.memory_space<vmem>>, vector<8x128xi32>
    %c0_i32 = arith.constant 0 : i32
    %1 = vector.broadcast %c0_i32 : i32 to vector<8x128xi32>
    %2 = arith.cmpi eq, %0, %1 : vector<8x128xi32>
    %3 = arith.extui %2 : vector<8x128xi1> to vector<8x128xi32>
    %4 = arith.sitofp %3 : vector<8x128xi32> to vector<8x128xf32>
    %5 = arith.truncf %4 : vector<8x128xf32> to vector<8x128xbf16>
    %c1_i32 = arith.constant 1 : i32
    %6 = vector.broadcast %c1_i32 : i32 to vector<8x128xi32>
    %7 = arith.cmpi eq, %0, %6 : vector<8x128xi32>
    %8 = arith.extui %7 : vector<8x128xi1> to vector<8x128xi32>
    %9 = arith.sitofp %8 : vector<8x128xi32> to vector<8x128xf32>
    %10 = arith.truncf %9 : vector<8x128xf32> to vector<8x128xbf16>
    %c2_i32 = arith.constant 2 : i32
    %11 = vector.broadcast %c2_i32 : i32 to vector<8x128xi32>
    %12 = arith.cmpi eq, %0, %11 : vector<8x128xi32>
    %13 = arith.extui %12 : vector<8x128xi1> to vector<8x128xi32>
    %14 = arith.sitofp %13 : vector<8x128xi32> to vector<8x128xf32>
    %15 = arith.truncf %14 : vector<8x128xf32> to vector<8x128xbf16>
    %c3_i32 = arith.constant 3 : i32
    %16 = vector.broadcast %c3_i32 : i32 to vector<8x128xi32>
    %17 = arith.cmpi eq, %0, %16 : vector<8x128xi32>
    %18 = arith.extui %17 : vector<8x128xi1> to vector<8x128xi32>
    %19 = arith.sitofp %18 : vector<8x128xi32> to vector<8x128xf32>
    %20 = arith.truncf %19 : vector<8x128xf32> to vector<8x128xbf16>
    %c4_i32 = arith.constant 4 : i32
    %21 = vector.broadcast %c4_i32 : i32 to vector<8x128xi32>
    %22 = arith.cmpi eq, %0, %21 : vector<8x128xi32>
    %23 = arith.extui %22 : vector<8x128xi1> to vector<8x128xi32>
    %24 = arith.sitofp %23 : vector<8x128xi32> to vector<8x128xf32>
    %25 = arith.truncf %24 : vector<8x128xf32> to vector<8x128xbf16>
    %26 = tpu.concatenate %5, %10, %15, %20, %25 in 1 : vector<8x128xbf16>, vector<8x128xbf16>, vector<8x128xbf16>, vector<8x128xbf16>, vector<8x128xbf16> -> vector<8x640xbf16>
    %c0_1 = arith.constant 0 : index
    %c0_2 = arith.constant 0 : index
    %27 = vector.load %arg3[%c0_1, %c0_2] : memref<640x384xbf16, #tpu.memory_space<vmem>>, vector<640x384xbf16>
    %cst = arith.constant dense<0.000000e+00> : vector<8x384xf32>
    %28 = tpu.matmul %26, %27, %cst {dimension_numbers = #tpu.dot_dimension_numbers<[1], [0], [0], [1], [0, 0, 1, 1], [], []>} : vector<8x640xbf16>, vector<640x384xbf16>, vector<8x384xf32> -> vector<8x384xf32>
    %c0_3 = arith.constant 0 : index
    %c0_4 = arith.constant 0 : index
    %29 = vector.load %arg4[%c0_3, %c0_4] : memref<1x384xf32, #tpu.memory_space<vmem>>, vector<1x384xf32>
    %30 = vector.broadcast %29 : vector<1x384xf32> to vector<8x384xf32>
    %31 = arith.addf %28, %30 : vector<8x384xf32>
    %32 = vector.extract_strided_slice %31 {offsets = [0, 0], sizes = [8, 128], strides = [1, 1]} : vector<8x384xf32> to vector<8x128xf32>
    %33 = vector.extract_strided_slice %31 {offsets = [0, 128], sizes = [8, 128], strides = [1, 1]} : vector<8x384xf32> to vector<8x128xf32>
    %34 = vector.extract_strided_slice %31 {offsets = [0, 256], sizes = [8, 128], strides = [1, 1]} : vector<8x384xf32> to vector<8x128xf32>
    %c0_5 = arith.constant 0 : index
    %c0_6 = arith.constant 0 : index
    %35 = vector.load %arg2[%c0_5, %c0_6] : memref<8x128xf32, #tpu.memory_space<vmem>>, vector<8x128xf32>
    %36 = math.exp %33 : vector<8x128xf32>
    %37 = arith.mulf %36, %35 : vector<8x128xf32>
    %38 = arith.addf %32, %37 : vector<8x128xf32>
    %cst_7 = arith.constant -5.000000e-01 : f32
    %39 = vector.broadcast %cst_7 : f32 to vector<8x128xf32>
    %40 = arith.mulf %39, %35 : vector<8x128xf32>
    %41 = arith.mulf %40, %35 : vector<8x128xf32>
    %42 = arith.subf %41, %33 : vector<8x128xf32>
    %cst_8 = arith.constant dense<0.000000e+00> : vector<8xf32>
    %43 = vector.multi_reduction <add>, %42, %cst_8 [1] : vector<8x128xf32> to vector<8xf32>
    %44 = vector.shape_cast %43 : vector<8xf32> to vector<8x1xf32>
    %cst_9 = arith.constant 41.3522339 : f32
    %45 = vector.broadcast %cst_9 : f32 to vector<8x1xf32>
    %46 = arith.subf %44, %45 : vector<8x1xf32>
    %cst_10 = arith.constant 0.000000e+00 : f32
    %47 = vector.broadcast %cst_10 : f32 to vector<8x1xf32>
    %48 = arith.subf %47, %46 : vector<8x1xf32>
    %49 = tpu.iota {dimensions = array<i32: 1>} : vector<8x128xi32>
    %c45_i32 = arith.constant 45 : i32
    %50 = vector.broadcast %c45_i32 : i32 to vector<8x128xi32>
    %51 = arith.cmpi eq, %49, %50 : vector<8x128xi32>
    %52 = vector.shape_cast %48 : vector<8x1xf32> to vector<8x1xf32>
    %53 = vector.broadcast %52 : vector<8x1xf32> to vector<8x128xf32>
    %54 = arith.select %51, %53, %38 : vector<8x128xi1>, vector<8x128xf32>
    %55 = tpu.concatenate %54, %34 in 1 : vector<8x128xf32>, vector<8x128xf32> -> vector<8x256xf32>
    %c0_11 = arith.constant 0 : index
    %c0_12 = arith.constant 0 : index
    %56 = vector.load %arg5[%c0_11, %c0_12] : memref<8x256xf32, #tpu.memory_space<vmem>>, vector<8x256xf32>
    tpu.vector_store %arg5[%c0_11, %c0_12], %55 {strides = array<i32>} : memref<8x256xf32, #tpu.memory_space<vmem>>, vector<8x256xf32>,
    return
  }
  func.func @transform_0(%arg0: i32) -> (i32, i32) {
    %c0_i32 = arith.constant 0 : i32
    %c0_i32_0 = arith.constant 0 : i32
    return %arg0, %c0_i32 : i32, i32
  }
  func.func @transform_1(%arg0: i32) -> (i32, i32) {
    %c0_i32 = arith.constant 0 : i32
    %c0_i32_0 = arith.constant 0 : i32
    return %arg0, %c0_i32 : i32, i32
  }
  func.func @transform_2(%arg0: i32) -> (i32, i32) {
    %c0_i32 = arith.constant 0 : i32
    %c0_i32_0 = arith.constant 0 : i32
    %c0_i32_1 = arith.constant 0 : i32
    return %c0_i32, %c0_i32_0 : i32, i32
  }
  func.func @transform_3(%arg0: i32) -> (i32, i32) {
    %c0_i32 = arith.constant 0 : i32
    %c0_i32_0 = arith.constant 0 : i32
    %c0_i32_1 = arith.constant 0 : i32
    return %c0_i32, %c0_i32_0 : i32, i32
  }
  func.func @transform_4(%arg0: i32) -> (i32, i32) {
    %c0_i32 = arith.constant 0 : i32
    %c0_i32_0 = arith.constant 0 : i32
    return %arg0, %c0_i32 : i32, i32
  }
}

</mosaic_0001>

<bundles_post_ra>
// kernel: argmax_flow_forward.1
= control target key start
LH: loop header
LB: loop body
LE: loop exit
PB: predicated region body
PF: predicated region fallthrough
CT: control target
= control target key end

     0   :  { %9 = vsyncpa [#allocation3], 0  ;;  %s1546_s15 = smov [#allocation2]   ;;  %s1656_s0 = inlined_call_operand.vmem [shape: s32[8,128], index: 0, kind: input, shape index: {}]   ;;  %s1657_s1 = inlined_call_operand.vmem [shape: f32[8,128], index: 1, kind: input, shape index: {}]   ;;  %s1658_s2 = inlined_call_operand.hbm [shape: bf16[640,384], index: 2, kind: input, shape index: {}]   ;;  %s1659_s3 = inlined_call_operand.vmem [shape: f32[1,384], index: 3, kind: input, shape index: {}]   ;;  %s1660_s4 = inlined_call_operand.vmem [shape: f32[8,256], index: 4, kind: output, shape index: {}]  }
   0x1   :  { %s19_s16 = sshll.u32 %s1546_s15, 4  ;;  %s20_s16 = int_to_ptr.vmem [resolvable:$true] %s19_s16 }
   0x2   :  { %s1532_s17 = scalar_lea.vmem %s20_s16, 15360  ;;  %p1537_p1 = scmp.lt.s32.totalorder %s20_s16, %s20_s16 }
   0x3   :  { %p1533_p0 = scmp.ne.s32.totalorder %s20_s16, %s1532_s17  ;;  %p1538_p2 = scmp.lt.s32.totalorder %s1532_s17, %s1532_s17 }
   0x5   :  { %p1539_p3 = por %p1538_p2, %p1537_p1 }
   0x7   :  { %p1540_p4 = pnand %p1539_p3, %p1533_p0 }
   0x9   :  { %1543 = shalt.err (!%p1540_p4)
}
   0xa   :  { %s1547_s18 = smov 192   ;;  %s1548_s19 = smov 12  }
   0xb   :  { %25 = dma.hbm_to_vmem [thread:$0]  %s1658_s2, 15360, %s20_s16, [#allocation3], %s1547_s18, %s1547_s18, %s1548_s19  }
   0xc   :  { %1544 = dma.done.wait [#allocation3], 15360  }
   0xd   :  { %1545 = vsyncadd [#allocation3], 4294951936  ;;  %v1362_v0 = vld [vmem:[#allocation2 + $0xac] ss:$12 sps:$4 sm:$0xff]   ;;  %v1364_v1 = vld [vmem:[#allocation2 + $0xa8] ss:$12 sps:$4 sm:$0xff]  }
   0xe   :  { %870 = vmatprep.subr.bf16.mxu0 %v1362_v0  ;;  %v1365_v2 = vld [vmem:[#allocation2 + $0x22c] ss:$12 sps:$4 sm:$0xff]   ;;  %v1367_v3 = vld [vmem:[#allocation2 + $0x228] ss:$12 sps:$4 sm:$0xff]   ;;  %v1370_v5 = vld [vmem:[#allocation2 + $0x90] ss:$12 sps:$4 sm:$0xff]  }
   0xf   :  { %871 = vmatpush1.bf16.msra.mxu0 %v1364_v1  ;;  %v1368_v4 = vld [vmem:[#allocation2 + $0x94] ss:$12 sps:$4 sm:$0xff]   ;;  %911 = vmatprep.subr.bf16.mxu1 %v1365_v2  ;;  %v1373_v7 = vld [vmem:[#allocation2 + $0x210] ss:$12 sps:$4 sm:$0xff]   ;;  %v1376_v9 = vld [vmem:[#allocation2 + $0x78] ss:$12 sps:$4 sm:$0xff]  }
  0x10   :  { %v1371_v6 = vld [vmem:[#allocation2 + $0x214] ss:$12 sps:$4 sm:$0xff]   ;;  %912 = vmatpush1.bf16.msra.mxu1 %v1367_v3  ;;  %872 = vmatprep.subr.bf16.mxu0 %v1368_v4  ;;  %v1374_v8 = vld [vmem:[#allocation2 + $0x7c] ss:$12 sps:$4 sm:$0xff]   ;;  %v1380_v11 = vld [vmem:[#allocation2 + $0x64] ss:$12 sps:$4 sm:$0xff]  }
  0x11   :  { %913 = vmatprep.subr.bf16.mxu1 %v1371_v6  ;;  %v1377_v10 = vld [vmem:[#allocation2 + $0x1fc] ss:$12 sps:$4 sm:$0xff]   ;;  %v1379_v12 = vld [vmem:[#allocation2 + $0x1f8] ss:$12 sps:$4 sm:$0xff]   ;;  %v1382_v14 = vld [vmem:[#allocation2 + $0x60] ss:$12 sps:$4 sm:$0xff]  }
  0x12   :  { %v1383_v13 = vld [vmem:[#allocation2 + $0x1e4] ss:$12 sps:$4 sm:$0xff]   ;;  %v1386_v15 = vld [vmem:[#allocation2 + $0x4c] ss:$12 sps:$4 sm:$0xff]   ;;  %v1388_v18 = vld [vmem:[#allocation2 + $0x48] ss:$12 sps:$4 sm:$0xff]  }
  0x13   :  { %873 = vmatpush1.bf16.msra.mxu0 %v1370_v5  ;;  %v1385_v16 = vld [vmem:[#allocation2 + $0x1e0] ss:$12 sps:$4 sm:$0xff]   ;;  %v1391_v20 = vld [vmem:[#allocation2 + $0x1c8] ss:$12 sps:$4 sm:$0xff]   ;;  %v1394_v22 = vld [vmem:[#allocation2 + $0x30] ss:$12 sps:$4 sm:$0xff]  }
  0x14   :  { %874 = vmatprep.subr.bf16.mxu0 %v1374_v8  ;;  %914 = vmatpush1.bf16.msra.mxu1 %v1373_v7  ;;  %v1389_v17 = vld [vmem:[#allocation2 + $0x1cc] ss:$12 sps:$4 sm:$0xff]   ;;  %v1392_v19 = vld [vmem:[#allocation2 + $0x34] ss:$12 sps:$4 sm:$0xff]   ;;  %v1398_v23 = vld [vmem:[#allocation2 + $0x1c] ss:$12 sps:$4 sm:$0xff]  }
  0x15   :  { %915 = vmatprep.subr.bf16.mxu1 %v1377_v10  ;;  %v1395_v21 = vld [vmem:[#allocation2 + $0x1b4] ss:$12 sps:$4 sm:$0xff]   ;;  %v1397_v24 = vld [vmem:[#allocation2 + $0x1b0] ss:$12 sps:$4 sm:$0xff]   ;;  %v1400_v26 = vld [vmem:[#allocation2 + $0x18] ss:$12 sps:$4 sm:$0xff]  }
  0x16   :  { %v1401_v25 = vld [vmem:[#allocation2 + $0x19c] ss:$12 sps:$4 sm:$0xff]   ;;  %v1404_v27 = vld [vmem:[#allocation2 + $0x4] ss:$12 sps:$4 sm:$0xff]   ;;  %v1406_v30 = vld [vmem:[#allocation2] ss:$12 sps:$4 sm:$0xff]  }
  0x17   :  { %875 = vmatpush1.bf16.msra.mxu0 %v1376_v9  ;;  %v1403_v28 = vld [vmem:[#allocation2 + $0x198] ss:$12 sps:$4 sm:$0xff]   ;;  %v1409_v32 = vld [vmem:[#allocation2 + $0x180] ss:$12 sps:$4 sm:$0xff]   ;;  %v1412_v34 = vld [vmem:[#allocation2 + $0x168] ss:$12 sps:$4 sm:$0xff]  }
  0x18   :  { %876 = vmatprep.subr.bf16.mxu0 %v1380_v11  ;;  %916 = vmatpush1.bf16.msra.mxu1 %v1379_v12  ;;  %v1407_v29 = vld [vmem:[#allocation2 + $0x184] ss:$12 sps:$4 sm:$0xff]   ;;  %v1410_v31 = vld [vmem:[#allocation2 + $0x16c] ss:$12 sps:$4 sm:$0xff]   ;;  %v1416_v35 = vld [vmem:[#allocation2 + $0x154] ss:$12 sps:$4 sm:$0xff]  }
  0x19   :  { %917 = vmatprep.subr.bf16.mxu1 %v1383_v13  ;;  %v1413_v33 = vld [vmem:[#allocation2 + $0x2ec] ss:$12 sps:$4 sm:$0xff]   ;;  %v1415_v36 = vld [vmem:[#allocation2 + $0x2e8] ss:$12 sps:$4 sm:$0xff]   ;;  %v1418_v38 = vld [vmem:[#allocation2 + $0x150] ss:$12 sps:$4 sm:$0xff]  }
  0x1a   :  { %v1419_v37 = vld [vmem:[#allocation2 + $0x2d4] ss:$12 sps:$4 sm:$0xff]   ;;  %v1422_v39 = vld [vmem:[#allocation2 + $0x13c] ss:$12 sps:$4 sm:$0xff]   ;;  %v1424_v42 = vld [vmem:[#allocation2 + $0x138] ss:$12 sps:$4 sm:$0xff]  }
  0x1b   :  { %877 = vmatpush1.bf16.msra.mxu0 %v1382_v14  ;;  %v1421_v40 = vld [vmem:[#allocation2 + $0x2d0] ss:$12 sps:$4 sm:$0xff]   ;;  %v1427_v44 = vld [vmem:[#allocation2 + $0x2b8] ss:$12 sps:$4 sm:$0xff]   ;;  %v1430_v47 = vld [vmem:[#allocation2 + $0x120] ss:$12 sps:$4 sm:$0xff]  }
  0x1c   :  { %878 = vmatprep.subr.bf16.mxu0 %v1386_v15  ;;  %918 = vmatpush1.bf16.msra.mxu1 %v1385_v16  ;;  %v1425_v41 = vld [vmem:[#allocation2 + $0x2bc] ss:$12 sps:$4 sm:$0xff]   ;;  %v1428_v43 = vld [vmem:[#allocation2 + $0x124] ss:$12 sps:$4 sm:$0xff]   ;;  %v1434_v48 = vld [vmem:[#allocation2 + $0x10c] ss:$12 sps:$4 sm:$0xff]  }
  0x1d   :  { %919 = vmatprep.subr.bf16.mxu1 %v1389_v17  ;;  %v1431_v45 = vld [vmem:[#allocation2 + $0x2a4] ss:$12 sps:$4 sm:$0xff]   ;;  %v1433_v50 = vld [vmem:[#allocation2 + $0x2a0] ss:$12 sps:$4 sm:$0xff]   ;;  %v1549_v51 = vmov 1.0|1.0  }
  0x1e   :  { %v1584_v46 = vld [vmem:[%s1656_s0] sm:$0xff]  ;;  %v1437_v52 = vld [vmem:[#allocation2 + $0x28c] ss:$12 sps:$4 sm:$0xff]   ;;  %v1436_v54 = vld [vmem:[#allocation2 + $0x108] ss:$12 sps:$4 sm:$0xff]   ;;  %v1550_v13 = vmov 0  }
  0x1f   :  { %879 = vmatpush1.bf16.msra.mxu0 %v1388_v18  ;;  %vm37_vm0 = vcmp.eq.s32.totalorder %v1584_v46, 1  ;;  %vm45_vm2 = vcmp.eq.s32.totalorder %v1584_v46, 3  ;;  %v1440_v55 = vld [vmem:[#allocation2 + $0xf4] ss:$12 sps:$4 sm:$0xff]   ;;  %v1442_v58 = vld [vmem:[#allocation2 + $0xf0] ss:$12 sps:$4 sm:$0xff]  }
  0x20   :  { %880 = vmatprep.subr.bf16.mxu0 %v1392_v19  ;;  %920 = vmatpush1.bf16.msra.mxu1 %v1391_v20  ;;  %vm1587_vm1 = vmpackc.low %vm37_vm0, %vm37_vm0  ;;  %v1439_v56 = vld [vmem:[#allocation2 + $0x288] ss:$12 sps:$4 sm:$0xff]   ;;  %v1445_v60 = vld [vmem:[#allocation2 + $0x270] ss:$12 sps:$4 sm:$0xff]   ;;  %vm33_vm4 = vcmp.eq.s32.totalorder %v1584_v46, 0  ;;  %vm41_vm6 = vcmp.eq.s32.totalorder %v1584_v46, 2 }
  0x21   :  { %921 = vmatprep.subr.bf16.mxu1 %v1395_v21  ;;  %1262 = vmatprep.mubr.msk.bf16.mxu0 %vm1587_vm1, %v1549_v51  ;;  %vm1595_vm3 = vmpackc.low %vm45_vm2, %vm45_vm2  ;;  %v1443_v57 = vld [vmem:[#allocation2 + $0x274] ss:$12 sps:$4 sm:$0xff]   ;;  %v1446_v59 = vld [vmem:[#allocation2 + $0xdc] ss:$12 sps:$4 sm:$0xff]   ;;  %vm49_vm8 = vcmp.eq.s32.totalorder %v1584_v46, 4  ;;  %vm1552_vm10 = vmmov 0  }
  0x22   :  { %1266 = vmatprep.mubr.msk.bf16.mxu1 %vm1595_vm3, %v1549_v51  ;;  %v1448_v61 = vld [vmem:[#allocation2 + $0xd8] ss:$12 sps:$4 sm:$0xff]   ;;  %v1449_v62 = vld [vmem:[#allocation2 + $0x25c] ss:$12 sps:$4 sm:$0xff]   ;;  %v1454_v1 = vld [vmem:[#allocation2 + $0xc0] ss:$12 sps:$4 sm:$0xff]  }
  0x23   :  { %881 = vmatpush1.bf16.msra.mxu0 %v1394_v22  ;;  %v1451_v63 = vld [vmem:[#allocation2 + $0x258] ss:$12 sps:$4 sm:$0xff]   ;;  %v1457_v3 = vld [vmem:[#allocation2 + $0x240] ss:$12 sps:$4 sm:$0xff]   ;;  %vm1603_vm5 = vmpackc.low %vm33_vm4, %vm33_vm4 }
  0x24   :  { %882 = vmatprep.subr.bf16.mxu0 %v1398_v23  ;;  %922 = vmatpush1.bf16.msra.mxu1 %v1397_v24  ;;  %v1452_v0 = vld [vmem:[#allocation2 + $0xc4] ss:$12 sps:$4 sm:$0xff]   ;;  %v1460_v4 = vld [vmem:[#allocation2 + $0x3ac] ss:$12 sps:$4 sm:$0xff]   ;;  %v1458_v6 = vld [vmem:[#allocation2 + $0x3a8] ss:$12 sps:$4 sm:$0xff]  }
  0x25   :  { %923 = vmatprep.subr.bf16.mxu1 %v1401_v25  ;;  %v1455_v2 = vld [vmem:[#allocation2 + $0x244] ss:$12 sps:$4 sm:$0xff]   ;;  %v1463_v8 = vld [vmem:[#allocation2 + $0x394] ss:$12 sps:$4 sm:$0xff]   ;;  %vm1608_vm7 = vmpackc.low %vm41_vm6, %vm41_vm6 }
  0x26   :  { %v1482_v7 = vld [vmem:[#allocation2 + $0x170] ss:$12 sps:$4 sm:$0xff]   ;;  %v1484_v11 = vld [vmem:[#allocation2 + $0x158] ss:$12 sps:$4 sm:$0xff]   ;;  %v1486_v16 = vld [vmem:[#allocation2 + $0x140] ss:$12 sps:$4 sm:$0xff]  }
  0x27   :  { %883 = vmatpush1.bf16.msra.mxu0 %v1400_v26  ;;  %v1483_v10 = vld [vmem:[#allocation2 + $0xb0] ss:$12 sps:$4 sm:$0xff]   ;;  %v1485_v15 = vld [vmem:[#allocation2 + $0x98] ss:$12 sps:$4 sm:$0xff]   ;;  %v1487_v19 = vld [vmem:[#allocation2 + $0x80] ss:$12 sps:$4 sm:$0xff]  }
  0x28   :  { %884 = vmatprep.subr.bf16.mxu0 %v1404_v27  ;;  %924 = vmatpush1.bf16.msra.mxu1 %v1403_v28  ;;  %v1461_v12 = vld [vmem:[#allocation2 + $0x390] ss:$12 sps:$4 sm:$0xff]   ;;  %v1464_v17 = vld [vmem:[#allocation2 + $0x378] ss:$12 sps:$4 sm:$0xff]   ;;  %v1488_v20 = vld [vmem:[#allocation2 + $0x128] ss:$12 sps:$4 sm:$0xff]  }
  0x29   :  { %925 = vmatprep.subr.bf16.mxu1 %v1407_v29  ;;  %v1466_v14 = vld [vmem:[#allocation2 + $0x37c] ss:$12 sps:$4 sm:$0xff]   ;;  %v1469_v18 = vld [vmem:[#allocation2 + $0x364] ss:$12 sps:$4 sm:$0xff]   ;;  %v1467_v21 = vld [vmem:[#allocation2 + $0x360] ss:$12 sps:$4 sm:$0xff]  }
  0x2a   :  { %v1472_v22 = vld [vmem:[#allocation2 + $0x34c] ss:$12 sps:$4 sm:$0xff]   ;;  %v1489_v23 = vld [vmem:[#allocation2 + $0x68] ss:$12 sps:$4 sm:$0xff]   ;;  %v1490_v24 = vld [vmem:[#allocation2 + $0x110] ss:$12 sps:$4 sm:$0xff]  }
  0x2b   :  { %885 = vmatpush1.bf16.msra.mxu0 %v1406_v30  ;;  %v1470_v25 = vld [vmem:[#allocation2 + $0x348] ss:$12 sps:$4 sm:$0xff]   ;;  %v1491_v27 = vld [vmem:[#allocation2 + $0x50] ss:$12 sps:$4 sm:$0xff]   ;;  %v1492_v28 = vld [vmem:[#allocation2 + $0xf8] ss:$12 sps:$4 sm:$0xff]  }
  0x2c   :  { %886 = vmatprep.subr.bf16.mxu0 %v1410_v31  ;;  %926 = vmatpush1.bf16.msra.mxu1 %v1409_v32  ;;  %v1475_v26 = vld [vmem:[#allocation2 + $0x334] ss:$12 sps:$4 sm:$0xff]   ;;  %v1473_v29 = vld [vmem:[#allocation2 + $0x330] ss:$12 sps:$4 sm:$0xff]   ;;  %v1493_v31 = vld [vmem:[#allocation2 + $0x38] ss:$12 sps:$4 sm:$0xff]  }
  0x2d   :  { %927 = vmatprep.subr.bf16.mxu1 %v1413_v33  ;;  %v1478_v30 = vld [vmem:[#allocation2 + $0x31c] ss:$12 sps:$4 sm:$0xff]   ;;  %v1494_v32 = vld [vmem:[#allocation2 + $0xe0] ss:$12 sps:$4 sm:$0xff]   ;;  %v1476_v33 = vld [vmem:[#allocation2 + $0x318] ss:$12 sps:$4 sm:$0xff]  }
  0x2e   :  { %vm1625_vm9 = vmpackc.low %vm49_vm8, %vm49_vm8  ;;  %v1503_v46 = vld [vmem:[#allocation2 + $0x2c0] ss:$12 sps:$4 sm:$0xff]   ;;  %v1506_v49 = vld [vmem:[#allocation2 + $0x2a8] ss:$12 sps:$4 sm:$0xff]  }
  0x2f   :  { %887 = vmatpush2.bf16.msra.mxu0 %v1412_v34  ;;  %v1481_v34 = vld [vmem:[#allocation2 + $0x304] ss:$12 sps:$4 sm:$0xff]   ;;  %v213_v5 = vld [vmem:[%s1659_s3] sm:$0x7] }
  0x30   :  { %888 = vmatprep.subr.bf16.mxu0 %v1416_v35  ;;  %928 = vmatpush2.bf16.msra.mxu1 %v1415_v36  ;;  %v1495_v35 = vld [vmem:[#allocation2 + $0x20] ss:$12 sps:$4 sm:$0xff]   ;;  %v1498_v36 = vld [vmem:[#allocation2 + $0xc8] ss:$12 sps:$4 sm:$0xff]   ;;  %v1509_v53 = vld [vmem:[#allocation2 + $0x290] ss:$12 sps:$4 sm:$0xff]  }
  0x31   :  { %929 = vmatprep.subr.bf16.mxu1 %v1419_v37  ;;  %v1479_v37 = vld [vmem:[#allocation2 + $0x300] ss:$12 sps:$4 sm:$0xff]  }
  0x33   :  { %889 = vmatpush2.bf16.msra.mxu0 %v1418_v38  ;;  %v1496_v38 = vld [vmem:[#allocation2 + $0x2f0] ss:$12 sps:$4 sm:$0xff]  }
  0x34   :  { %890 = vmatprep.subr.bf16.mxu0 %v1422_v39  ;;  %930 = vmatpush2.bf16.msra.mxu1 %v1421_v40  ;;  %v1499_v39 = vld [vmem:[#allocation2 + $0x8] ss:$12 sps:$4 sm:$0xff]  }
  0x35   :  { %931 = vmatprep.subr.bf16.mxu1 %v1425_v41  ;;  %v1497_v41 = vld [vmem:[#allocation2 + $0x230] ss:$12 sps:$4 sm:$0xff]  }
  0x37   :  { %891 = vmatpush2.bf16.msra.mxu0 %v1424_v42  ;;  %v1500_v42 = vld [vmem:[#allocation2 + $0x2d8] ss:$12 sps:$4 sm:$0xff]  }
  0x38   :  { %892 = vmatprep.subr.bf16.mxu0 %v1428_v43  ;;  %932 = vmatpush2.bf16.msra.mxu1 %v1427_v44  ;;  %v1502_v43 = vld [vmem:[#allocation2 + $0x3b0] ss:$12 sps:$4 sm:$0xff]   ;;  %v1551_v44 = vmov 0.0  }
  0x39   :  { %933 = vmatprep.subr.bf16.mxu1 %v1431_v45  ;;  %v1501_v45 = vld [vmem:[#allocation2 + $0x218] ss:$12 sps:$4 sm:$0xff]  }
  0x3b   :  { %893 = vmatpush2.bf16.msra.mxu0 %v1430_v47  ;;  %v1505_v47 = vld [vmem:[#allocation2 + $0x398] ss:$12 sps:$4 sm:$0xff]  }
  0x3c   :  { %894 = vmatprep.subr.bf16.mxu0 %v1434_v48  ;;  %934 = vmatpush2.bf16.msra.mxu1 %v1433_v50  ;;  %v1504_v48 = vld [vmem:[#allocation2 + $0x200] ss:$12 sps:$4 sm:$0xff]  }
  0x3d   :  { %935 = vmatprep.subr.bf16.mxu1 %v1437_v52  ;;  %v1508_v50 = vld [vmem:[#allocation2 + $0x380] ss:$12 sps:$4 sm:$0xff]   ;;  %v1507_v52 = vld [vmem:[#allocation2 + $0x1e8] ss:$12 sps:$4 sm:$0xff]  }
  0x3f   :  { %895 = vmatpush2.bf16.msra.mxu0 %v1436_v54  ;;  %v1511_v54 = vld [vmem:[#allocation2 + $0x368] ss:$12 sps:$4 sm:$0xff]  }
  0x40   :  { %896 = vmatprep.subr.bf16.mxu0 %v1440_v55  ;;  %936 = vmatpush2.bf16.msra.mxu1 %v1439_v56  ;;  %v1510_v55 = vld [vmem:[#allocation2 + $0x1d0] ss:$12 sps:$4 sm:$0xff]   ;;  %v1512_v56 = vld [vmem:[#allocation2 + $0x278] ss:$12 sps:$4 sm:$0xff]  }
  0x41   :  { %937 = vmatprep.subr.bf16.mxu1 %v1443_v57  ;;  %v1514_v57 = vld [vmem:[#allocation2 + $0x350] ss:$12 sps:$4 sm:$0xff]  }
  0x43   :  { %897 = vmatpush2.bf16.msra.mxu0 %v1442_v58  ;;  %v1513_v58 = vld [vmem:[#allocation2 + $0x1b8] ss:$12 sps:$4 sm:$0xff]  }
  0x44   :  { %898 = vmatprep.subr.bf16.mxu0 %v1446_v59  ;;  %938 = vmatpush2.bf16.msra.mxu1 %v1445_v60  ;;  %v1515_v59 = vld [vmem:[#allocation2 + $0x260] ss:$12 sps:$4 sm:$0xff]   ;;  %v1517_v60 = vld [vmem:[#allocation2 + $0x338] ss:$12 sps:$4 sm:$0xff]  }
  0x45   :  { %939 = vmatprep.subr.bf16.mxu1 %v1449_v62  ;;  %v1518_v62 = vld [vmem:[#allocation2 + $0x248] ss:$12 sps:$4 sm:$0xff]  }
  0x47   :  { %899 = vmatpush2.bf16.msra.mxu0 %v1448_v61  ;;  %v1516_v61 = vld [vmem:[#allocation2 + $0x1a0] ss:$12 sps:$4 sm:$0xff]  }
  0x48   :  { %900 = vmatprep.subr.bf16.mxu0 %v1452_v0  ;;  %940 = vmatpush2.bf16.msra.mxu1 %v1451_v63  ;;  %v1520_v63 = vld [vmem:[#allocation2 + $0x320] ss:$12 sps:$4 sm:$0xff]   ;;  %v1519_v0 = vld [vmem:[#allocation2 + $0x188] ss:$12 sps:$4 sm:$0xff]  }
  0x49   :  { %941 = vmatprep.subr.bf16.mxu1 %v1455_v2  ;;  %v215_v2 = vlaneseq }
  0x4b   :  { %901 = vmatpush2.bf16.msra.mxu0 %v1454_v1  ;;  %v1521_v1 = vld [vmem:[#allocation2 + $0x308] ss:$12 sps:$4 sm:$0xff]  }
  0x4c   :  { %952 = vmatprep.subr.bf16.mxu0 %v1460_v4  ;;  %942 = vmatpush2.bf16.msra.mxu1 %v1457_v3  ;;  %v216_v3 = vshrl.u32 %v215_v2, 7 }
  0x4d   :  { %1282 = vmatprep.subr.bf16.mxu1 %v1482_v7 }
  0x4e   :  { %1264 = vmatmul.mubr.msk.bf16.vlgmr.msra.gmra.mxu0 %vm1603_vm5, %v1549_v51  ;;  %v217_v4 = vsub.s32 0, %v216_v3 }
  0x4f   :  { %953 = vmatpush1.bf16.msra.mxu0 %v1458_v6  ;;  %984 = vmatprep.mubr.bf16.mxu0 %v1550_v13 }
  0x50   :  { %1268 = vmatmul.mubr.msk.bf16.vlgmr.msra.gmra.mxu1 %vm1608_vm7, %v1549_v51  ;;  %954 = vmatprep.subr.bf16.mxu0 %v1463_v8  ;;  %v218_v6 = vrot.slane %v213_v5, %v217_v4 }
  0x51   :  { %1283 = vmatpush3.bf16.msra.mxu1 %v1483_v10  ;;  %1272 = vmatprep.mubr.msk.bf16.mxu1 %vm1587_vm1, %v1549_v51 }
  0x52   :  { %1284 = vmatprep.subr.bf16.mxu1 %v1484_v11 }
  0x53   :  { %955 = vmatpush1.bf16.msra.mxu0 %v1461_v12 }
  0x54   :  { %956 = vmatprep.subr.bf16.mxu0 %v1466_v14 }
  0x55   :  { %1285 = vmatpush3.bf16.msra.mxu1 %v1485_v15 }
  0x56   :  { %1286 = vmatprep.subr.bf16.mxu1 %v1486_v16 }
  0x57   :  { %957 = vmatpush1.bf16.msra.mxu0 %v1464_v17  ;;  %v221_v17 = vsub.s32 1, %v216_v3 }
  0x58   :  { %958 = vmatprep.subr.bf16.mxu0 %v1469_v18  ;;  %v1113_v18 = vld [vmem:[%s1657_s1] sm:$0xff] }
  0x59   :  { %1287 = vmatpush3.bf16.msra.mxu1 %v1487_v19 }
  0x5a   :  { %1288 = vmatprep.subr.bf16.mxu1 %v1488_v20  ;;  %v1118_v20 = vmul.f32 -0.5, %v1113_v18 }
  0x5b   :  { %959 = vmatpush1.bf16.msra.mxu0 %v1467_v21 }
  0x5c   :  { %960 = vmatprep.subr.bf16.mxu0 %v1472_v22 }
  0x5d   :  { %1289 = vmatpush3.bf16.msra.mxu1 %v1489_v23 }
  0x5e   :  { %1290 = vmatprep.subr.bf16.mxu1 %v1490_v24  ;;  %v1119_v24 = vmul.f32 %v1118_v20, %v1113_v18 }
  0x5f   :  { %961 = vmatpush1.bf16.msra.mxu0 %v1470_v25 }
  0x60   :  { %962 = vmatprep.subr.bf16.mxu0 %v1475_v26 }
  0x61   :  { %1291 = vmatpush3.bf16.msra.mxu1 %v1491_v27 }
  0x62   :  { %1292 = vmatprep.subr.bf16.mxu1 %v1492_v28 }
  0x63   :  { %963 = vmatpush1.bf16.msra.mxu0 %v1473_v29 }
  0x64   :  { %964 = vmatprep.subr.bf16.mxu0 %v1478_v30 }
  0x65   :  { %1293 = vmatpush3.bf16.msra.mxu1 %v1493_v31 }
  0x66   :  { %1294 = vmatprep.subr.bf16.mxu1 %v1494_v32 }
  0x67   :  { %965 = vmatpush1.bf16.msra.mxu0 %v1476_v33 }
  0x68   :  { %966 = vmatprep.subr.bf16.mxu0 %v1481_v34 }
  0x69   :  { %1295 = vmatpush3.bf16.msra.mxu1 %v1495_v35 }
  0x6a   :  { %1296 = vmatprep.subr.bf16.mxu1 %v1498_v36 }
  0x6b   :  { %967 = vmatpush1.bf16.msra.mxu0 %v1479_v37 }
  0x6c   :  { %1304 = vmatprep.subr.bf16.mxu0 %v1496_v38  ;;  %v225_v38 = vsub.s32 2, %v216_v3 }
  0x6d   :  { %1297 = vmatpush3.bf16.msra.mxu1 %v1499_v39 }
  0x6e   :  { %1270 = vmatmul.mubr.msk.bf16.vlgmr.msra.gmra.mxu0 %vm1625_vm9, %v1549_v51  ;;  %1335 = vmatprep.subr.bf16.mxu1 %v1551_v44  ;;  %v226_v39 = vrot.slane %v213_v5, %v225_v38 }
  0x6f   :  { %1305 = vmatpush3.bf16.msra.mxu0 %v1497_v41  ;;  %1276 = vmatprep.mubr.msk.bf16.mxu0 %vm1595_vm3, %v1549_v51 }
  0x70   :  { %1306 = vmatprep.subr.bf16.mxu0 %v1500_v42  ;;  %1274 = vmatmul.mubr.msk.bf16.vlgmr.msra.gmra.mxu1 %vm1603_vm5, %v1549_v51 }
  0x71   :  { %1336 = vmatpush3.bf16.msra.mxu1 %v1502_v43  ;;  %1351 = vmatprep.mubr.msk.bf16.mxu1 %vm1552_vm10, %v1551_v44 }
  0x72   :  { %1337 = vmatprep.subr.bf16.mxu1 %v1551_v44 }
  0x73   :  { %1307 = vmatpush3.bf16.msra.mxu0 %v1501_v45 }
  0x74   :  { %1308 = vmatprep.subr.bf16.mxu0 %v1503_v46 }
  0x75   :  { %1338 = vmatpush3.bf16.msra.mxu1 %v1505_v47 }
  0x76   :  { %1339 = vmatprep.subr.bf16.mxu1 %v1551_v44 }
  0x77   :  { %1309 = vmatpush3.bf16.msra.mxu0 %v1504_v48 }
  0x78   :  { %1310 = vmatprep.subr.bf16.mxu0 %v1506_v49 }
  0x79   :  { %1340 = vmatpush3.bf16.msra.mxu1 %v1508_v50 }
  0x7a   :  { %1341 = vmatprep.subr.bf16.mxu1 %v1551_v44 }
  0x7b   :  { %1311 = vmatpush3.bf16.msra.mxu0 %v1507_v52 }
  0x7c   :  { %1312 = vmatprep.subr.bf16.mxu0 %v1509_v53 }
  0x7d   :  { %1342 = vmatpush3.bf16.msra.mxu1 %v1511_v54  ;;  %v1126_v54 = vand.u32 127, %v215_v2 }
  0x7e   :  { %1343 = vmatprep.subr.bf16.mxu1 %v1551_v44 }
  0x7f   :  { %1313 = vmatpush3.bf16.msra.mxu0 %v1510_v55  ;;  %vm1127_vm11 = vcmp.eq.s32.totalorder %v1126_v54, 45 }
  0x80   :  { %1314 = vmatprep.subr.bf16.mxu0 %v1512_v56 }
  0x81   :  { %1344 = vmatpush3.bf16.msra.mxu1 %v1514_v57 }
  0x82   :  { %1345 = vmatprep.subr.bf16.mxu1 %v1551_v44 }
  0x83   :  { %1315 = vmatpush3.bf16.msra.mxu0 %v1513_v58 }
  0x84   :  { %1316 = vmatprep.subr.bf16.mxu0 %v1515_v59 }
  0x85   :  { %1346 = vmatpush3.bf16.msra.mxu1 %v1517_v60 }
  0x86   :  { %1347 = vmatprep.subr.bf16.mxu1 %v1551_v44 }
  0x87   :  { %1317 = vmatpush3.bf16.msra.mxu0 %v1516_v61 }
  0x88   :  { %1318 = vmatprep.subr.bf16.mxu0 %v1518_v62 }
  0x89   :  { %1348 = vmatpush3.bf16.msra.mxu1 %v1520_v63 }
  0x8a   :  { %1349 = vmatprep.subr.bf16.mxu1 %v1551_v44 }
  0x8b   :  { %1319 = vmatpush3.bf16.msra.mxu0 %v1519_v0 }
  0x8d   :  { %1350 = vmatpush3.bf16.msra.mxu1 %v1521_v1 }
  0x8e   :  { %1278 = vmatmul.mubr.msk.bf16.vlgmr.msra.gmra.mxu0 %vm1608_vm7, %v1549_v51 }
  0x90   :  { %1352 = vmatmul.mubr.msk.bf16.vlgmr.msra.gmra.mxu1 %vm1625_vm9, %v1549_v51  ;;  %v222_v51 = vrot.slane %v213_v5, %v221_v17 }
 0x10e   :  { %v904_v7 = vpop.f32.mrf.mxu0 }
 0x10f   :  { %v905_v8 = vadd.f32 %v904_v7, %v218_v6 }
 0x110   :  { %v906_v10 = vpop.f32.mrf.mxu0  ;;  %v945_v11 = vpop.f32.mrf.mxu1 }
 0x111   :  { %v946_v12 = vadd.f32 %v945_v11, %v905_v8  ;;  %v907_v19 = vadd.f32 %v906_v10, %v222_v51 }
 0x112   :  { %v908_v13 = vpop.f32.mrf.mxu0  ;;  %v947_v9 = vpop.f32.mrf.mxu1 }
 0x113   :  { %v948_v22 = vadd.f32 %v947_v9, %v907_v19 }
 0x114   :  { %v909_v14 = vpop.f32.mrf.mxu0  ;;  %v949_v15 = vpop.f32.mrf.mxu1 }
 0x116   :  { %v950_v16 = vpop.f32.mrf.mxu1 }
 0x12e   :  { %v986_v21 = vpop.f32.mrf.mxu0 }
 0x12f   :  { %v987_v23 = vadd.f32 %v986_v21, %v946_v12 }
 0x130   :  { %v988_v25 = vpop.f32.mrf.mxu0  ;;  %v1298_v26 = vpop.f32.mrf.mxu1 }
 0x131   :  { %v989_v27 = vadd.f32 %v988_v25, %v948_v22 }
 0x132   :  { %v990_v28 = vpop.f32.mrf.mxu0  ;;  %v1299_v29 = vpop.f32.mrf.mxu1 }
 0x133   :  { %v1114_v30 = vmul.f32 1.442695, %v989_v27  ;;  %v1120_v31 = vsub.f32 %v1119_v24, %v989_v27  ;;  %v1300_v40 = vadd.f32 %v1299_v29, %v1298_v26 }
 0x134   :  { %v991_v32 = vpop.f32.mrf.mxu0  ;;  %v1301_v33 = vpop.f32.mrf.mxu1 }
 0x135   :  { %1522 = vpow2.f32 %v1114_v30  ;;  %1121 = vadd.xlane.f32.xlu0 %v1120_v31  ;;  %v1028_v42 = vadd.f32 %v1300_v40, %v226_v39 }
 0x136   :  { %v1302_v34 = vpop.f32.mrf.mxu1 }
 0x142   :  { %v1523_v35 = vpop.eup %1522 }
 0x143   :  { %v1116_v36 = vmul.f32 %v1523_v35, %v1113_v18 }
 0x145   :  { %v1117_v37 = vadd.f32 %v1116_v36, %v987_v23 }
 0x14e   :  { %v1320_v41 = vpop.f32.mrf.mxu0 }
 0x150   :  { %v1321_v43 = vpop.f32.mrf.mxu0  ;;  %v1107_v44 = vpop.f32.mrf.mxu1 }
 0x151   :  { %v1322_v45 = vadd.f32 %v1321_v43, %v1320_v41 }
 0x152   :  { %v1323_v46 = vpop.f32.mrf.mxu0  ;;  %v1353_v47 = vpop.f32.mrf.mxu1 }
 0x153   :  { %v1068_v48 = vadd.f32 %v1322_v45, %v1028_v42 }
 0x154   :  { %v1324_v49 = vpop.f32.mrf.mxu0  ;;  %v1110_v50 = vpop.f32.mrf.mxu1 }
 0x155   :  { %v1108_v52 = vadd.f32 %v1107_v44, %v1068_v48 }
 0x156   :  { %v1354_v53 = vpop.f32.mrf.mxu1 }
 0x157   :  { %1130 = vst [vmem:[%s1660_s4 + $0x8] sm:$0xff] %v1108_v52 }
 0x1be   :  { %v1122_v55 = vpop.xlane.xlu0 %1121 }
 0x1bf   :  { %v1281_v56 = vadd.f32 -41.352234, %v1122_v55 }
 0x1c1   :  { %v1124_v57 = vsub.f32 0.0, %v1281_v56 }
 0x1c3   :  { %v1128_v58 = vsel %vm1127_vm11, %v1124_v57, %v1117_v37 }
 0x1c4   :  { %1129 = vst [vmem:[%s1660_s4] sm:$0xff] %v1128_v58 }
 0x1c5   :  { %1135 = vsyncpa [#allocation3], 1 }

</bundles_post_ra>
